<compile_context>
chip_gen: v7x
topology: tpu7x:2x2x1
jax: 0.10.0
libtpu: 0.0.40
codegen_flags: <defaults>
</compile_context>

<pallas_src>
import functools

import jax
import jax.numpy as jnp
from jax.experimental import pallas as pl
from jax.experimental.pallas import tpu as pltpu


def _round_up(x, m):
    return (x + m - 1) // m * m


# ---------------------------------------------------------------------------
# Kernel
# ---------------------------------------------------------------------------
def _cvae_kernel(x_ref, c_ref, eps_ref, p_ref, out_ref, *,
                 features, recon_size, off, rows):
    """One batch tile of the CVAE forward.

    x_ref:   (bm, input_size)
    c_ref:   (bm, cond_size)
    eps_ref: (bm, features)
    p_ref:   (P, W) packed params (grid-invariant), zero-padded per block
    out_ref: (bm, recon_size + 2*features)  = [recon | mu | log_var]
    """

    def w(name):
        o, r = off[name], rows[name]               # static python ints
        return p_ref[o:o + r, :]                   # full padded lane width

    x = x_ref[...]
    c = c_ref[...]
    eps = eps_ref[...]

    # ---- encoder layer 1: Linear(input+cond -> H) as split dots, ReLU ----
    h = (jnp.dot(x, w("w1x"), preferred_element_type=jnp.float32)
         + jnp.dot(c, w("w1c"), preferred_element_type=jnp.float32)
         + w("b1"))
    h = jnp.maximum(h, 0.0)                        # padded lanes stay 0

    # ---- encoder head: fused Linear(H -> 2*features) -> [mu | log_var] ----
    mulv = jnp.dot(h, w("w2"), preferred_element_type=jnp.float32) + w("b2")
    mu = mulv[:, :features]
    log_var = mulv[:, features:2 * features]

    # ---- reparameterize: z = mu + eps * exp(0.5 * log_var) ----
    z = mu + eps * jnp.exp(0.5 * log_var)

    # ---- decoder layer 1: Linear(features+cond -> H) as split dots, ReLU ----
    d1 = (jnp.dot(z, w("d1z"), preferred_element_type=jnp.float32)
          + jnp.dot(c, w("d1c"), preferred_element_type=jnp.float32)
          + w("db1"))
    d1 = jnp.maximum(d1, 0.0)

    # ---- decoder layer 2: Linear(H -> H), ReLU ----
    d2 = jnp.dot(d1, w("d2"), preferred_element_type=jnp.float32) + w("db2")
    d2 = jnp.maximum(d2, 0.0)

    # ---- decoder layer 3: Linear(H -> reconstruct_size) ----
    recon = jnp.dot(d2, w("d3"), preferred_element_type=jnp.float32) + w("db3")

    # ---- single full-width store of the fused output slab ----
    out_ref[...] = jnp.concatenate(
        [recon[:, :recon_size], mulv[:, :2 * features]], axis=-1)


# ---------------------------------------------------------------------------
# Parameter packing
# ---------------------------------------------------------------------------
def pack_params(params, *, input_size, cond_size, features, hidden, recon_size):
    """Packs all weights/biases into one (rows, width) f32 buffer.

    The encoder/decoder layer-1 weights are pre-split into their x/c (z/c)
    row blocks so the in-kernel concats become split dots.  Every block is
    zero-padded to `width` lanes and to a multiple of 8 rows; blocks that are
    contracted against a full-width intermediate (w2, d2, d3) are row-padded
    to `width` rows so the kernel can dot the full padded width exactly.
    """
    assert params["w1"].shape == (input_size + cond_size, hidden)
    assert params["w2"].shape == (hidden, 2 * features)
    assert params["d1"].shape == (features + cond_size, hidden)
    assert params["d2"].shape == (hidden, hidden)
    assert params["d3"].shape == (hidden, recon_size)

    blocks = {
        "w1x": params["w1"][:input_size],
        "w1c": params["w1"][input_size:],
        "b1":  params["b1"],
        "w2":  params["w2"],
        "b2":  params["b2"],
        "d1z": params["d1"][:features],
        "d1c": params["d1"][features:],
        "db1": params["db1"],
        "d2":  params["d2"],
        "db2": params["db2"],
        "d3":  params["d3"],
        "db3": params["db3"],
    }
    order = ("w1x", "w1c", "b1", "w2", "b2",
             "d1z", "d1c", "db1", "d2", "db2", "d3", "db3")

    width = max(int(v.shape[1]) for v in blocks.values())
    assert width >= hidden

    # Row counts the kernel contracts over / slices out.
    rows = {"w1x": input_size, "w1c": cond_size, "b1": 1,
            "w2": width, "b2": 1,
            "d1z": features, "d1c": cond_size, "db1": 1,
            "d2": width, "db2": 1,
            "d3": width, "db3": 1}

    chunks, offsets, row = [], {}, 0
    for k in order:
        p = blocks[k].astype(jnp.float32)
        r, cc = p.shape
        rp = _round_up(max(r, rows[k]), 8)         # sublane-aligned block
        chunks.append(jnp.pad(p, ((0, rp - r), (0, width - cc))))
        assert row % 8 == 0
        offsets[k] = row
        row += rp
    return jnp.concatenate(chunks, axis=0), offsets, rows


# ---------------------------------------------------------------------------
# Wrapper
# ---------------------------------------------------------------------------
def _choose_tile(B, bm_max, min_grid):
    """Split B into the fewest tiles <= bm_max (bounded padding), but keep
    >= min_grid grid steps when B allows so v7x's two TCs both get work."""
    bm_max = max(8, _round_up(bm_max, 8))
    n = pl.cdiv(B, bm_max)
    if B > 8:
        n = max(n, min_grid)
    bm = max(8, _round_up(pl.cdiv(B, n), 8))
    n = max(pl.cdiv(B, bm), 1)
    return bm, n


def conditional_vae_forward(x, c, eps, params, *, bm_max=8192, min_grid=2):
    """CVAE forward. x: (B, input), c: (B, cond), eps: (B, features)."""
    B, input_size = x.shape
    cond_size = c.shape[-1]
    features = eps.shape[-1]
    hidden = params["w1"].shape[-1]
    recon_size = params["d3"].shape[-1]
    out_w = recon_size + 2 * features

    bm, n_tiles = _choose_tile(B, bm_max, min_grid)
    Bp = bm * n_tiles

    x = x.astype(jnp.float32)
    c = c.astype(jnp.float32)
    eps = eps.astype(jnp.float32)
    if Bp != B:                                    # bounded (<8 rows/tile) pad
        pad = ((0, Bp - B), (0, 0))
        x, c, eps = jnp.pad(x, pad), jnp.pad(c, pad), jnp.pad(eps, pad)

    pbuf, offsets, rows = pack_params(
        params, input_size=input_size, cond_size=cond_size,
        features=features, hidden=hidden, recon_size=recon_size)

    kernel = functools.partial(
        _cvae_kernel, features=features, recon_size=recon_size,
        off=offsets, rows=rows)

    grid_spec = pltpu.PrefetchScalarGridSpec(
        num_scalar_prefetch=0,
        grid=(n_tiles,),
        in_specs=[
            pl.BlockSpec((bm, input_size), lambda i: (i, 0)),   # x
            pl.BlockSpec((bm, cond_size), lambda i: (i, 0)),    # c
            pl.BlockSpec((bm, features), lambda i: (i, 0)),     # eps
            pl.BlockSpec(pbuf.shape, lambda i: (0, 0)),         # packed params
        ],
        out_specs=pl.BlockSpec((bm, out_w), lambda i: (i, 0)),
    )

    out = pl.pallas_call(
        kernel,
        out_shape=jax.ShapeDtypeStruct((Bp, out_w), jnp.float32),
        grid_spec=grid_spec,
        compiler_params=pltpu.CompilerParams(
            dimension_semantics=("parallel",),
            vmem_limit_bytes=32 * 1024 * 1024,
        ),
    )(x, c, eps, pbuf)

    recon = out[:B, :recon_size]
    mu = out[:B, recon_size:recon_size + features]
    log_var = out[:B, recon_size + features:]
    return recon, mu, log_var


# ---------------------------------------------------------------------------
# Init + pure-JAX reference (PyTorch semantics)
# ---------------------------------------------------------------------------
def init_params(key, features, input_size, condition_size, reconstruct_size,
                hidden_size=32):
    """PyTorch nn.Linear-style init (uniform +-1/sqrt(fan_in)); weights stored
    transposed as (in, out), biases as (1, out)."""
    H = hidden_size

    def linear(k, fan_in, shape):
        bound = float(fan_in) ** -0.5
        return jax.random.uniform(k, shape, jnp.float32, -bound, bound)

    keys = jax.random.split(key, 10)
    enc_in = input_size + condition_size
    dec_in = features + condition_size
    return {
        "w1": linear(keys[0], enc_in, (enc_in, H)),
        "b1": linear(keys[1], enc_in, (1, H)),
        "w2": linear(keys[2], H, (H, 2 * features)),
        "b2": linear(keys[3], H, (1, 2 * features)),
        "d1": linear(keys[4], dec_in, (dec_in, H)),
        "db1": linear(keys[5], dec_in, (1, H)),
        "d2": linear(keys[6], H, (H, H)),
        "db2": linear(keys[7], H, (1, H)),
        "d3": linear(keys[8], H, (H, reconstruct_size)),
        "db3": linear(keys[9], H, (1, reconstruct_size)),
    }


def reference_forward(x, c, eps, params):
    F = eps.shape[-1]
    xc = jnp.concatenate([x, c], axis=-1)
    h = jnp.maximum(xc @ params["w1"] + params["b1"], 0.0)
    mulv = h @ params["w2"] + params["b2"]
    mu, log_var = mulv[:, :F], mulv[:, F:]
    z = mu + eps * jnp.exp(0.5 * log_var)
    zc = jnp.concatenate([z, c], axis=-1)
    d1 = jnp.maximum(zc @ params["d1"] + params["db1"], 0.0)
    d2 = jnp.maximum(d1 @ params["d2"] + params["db2"], 0.0)
    recon = d2 @ params["d3"] + params["db3"]
    return recon, mu, log_var


if __name__ == "__main__":
    features = 4
    input_size = 16
    condition_size = 8
    reconstruct_size = 16
    hidden_size = 32

    key = jax.random.PRNGKey(0)
    k_params, k_data = jax.random.split(key)
    params = init_params(k_params, features, input_size, condition_size,
                         reconstruct_size, hidden_size)

    def run_and_check(batch, **kw):
        kx, kc, ke = jax.random.split(jax.random.fold_in(k_data, batch), 3)
        x = jax.random.normal(kx, (batch, input_size), jnp.float32)
        c = jax.random.normal(kc, (batch, condition_size), jnp.float32)
        # reparameterization noise (torch.randn_like), generated outside kernel
        eps = jax.random.normal(ke, (batch, features), jnp.float32)

        recon, mu, log_var = conditional_vae_forward(x, c, eps, params, **kw)
        jax.block_until_ready((recon, mu, log_var))

        r_ref, mu_ref, lv_ref = reference_forward(x, c, eps, params)
        assert jnp.allclose(recon, r_ref, atol=1e-4, rtol=1e-4)
        assert jnp.allclose(mu, mu_ref, atol=1e-4, rtol=1e-4)
        assert jnp.allclose(log_var, lv_ref, atol=1e-4, rtol=1e-4)

    # small batch -> single tile, single grid step
    run_and_check(batch=8)
    # ragged batch, forced small tiles -> multi-step parallel grid + padding path
    run_and_check(batch=37, bm_max=16)
    # larger batch with default tiling -> 2 parallel tiles (v7x dual-TC path)
    run_and_check(batch=1000)

    print("KERNEL_OK")
</pallas_src>

<mosaic_0001>
module attributes {stable_mosaic.version = 11 : i64} {
  func.func @_cvae_kernel(%arg0: i32, %arg1: memref<8x16xf32, #tpu.memory_space<vmem>>, %arg2: memref<8x8xf32, #tpu.memory_space<vmem>>, %arg3: memref<8x4xf32, #tpu.memory_space<vmem>>, %arg4: memref<176x32xf32, #tpu.memory_space<vmem>>, %arg5: memref<8x24xf32, #tpu.memory_space<vmem>>) attributes {dimension_semantics = [#tpu.dimension_semantics<parallel>], iteration_bounds = array<i64: 1>, scalar_prefetch = 0 : i64, scratch_operands = 0 : i64, tpu.core_type = #tpu.core_type<tc>, window_params = [{transform_indices = @transform_0, window_bounds = array<i64: 8, 16>}, {transform_indices = @transform_1, window_bounds = array<i64: 8, 8>}, {transform_indices = @transform_2, window_bounds = array<i64: 8, 4>}, {pipeline_mode = #tpu.pipeline_mode<synchronous>, transform_indices = @transform_3, window_bounds = array<i64: 176, 32>}, {transform_indices = @transform_4, window_bounds = array<i64: 8, 24>}]} {
    %c0 = arith.constant 0 : index
    %c0_0 = arith.constant 0 : index
    %0 = vector.load %arg1[%c0, %c0_0] : memref<8x16xf32, #tpu.memory_space<vmem>>, vector<8x16xf32>
    %c0_1 = arith.constant 0 : index
    %c0_2 = arith.constant 0 : index
    %1 = vector.load %arg2[%c0_1, %c0_2] : memref<8x8xf32, #tpu.memory_space<vmem>>, vector<8x8xf32>
    %c0_3 = arith.constant 0 : index
    %c0_4 = arith.constant 0 : index
    %2 = vector.load %arg3[%c0_3, %c0_4] : memref<8x4xf32, #tpu.memory_space<vmem>>, vector<8x4xf32>
    %c0_5 = arith.constant 0 : index
    %c0_6 = arith.constant 0 : index
    %3 = vector.load %arg4[%c0_5, %c0_6] : memref<176x32xf32, #tpu.memory_space<vmem>>, vector<16x32xf32>
    %cst = arith.constant dense<0.000000e+00> : vector<8x32xf32>
    %4 = tpu.matmul %0, %3, %cst {dimension_numbers = #tpu.dot_dimension_numbers<[1], [0], [0], [1], [0, 0, 1, 1], [], []>} : vector<8x16xf32>, vector<16x32xf32>, vector<8x32xf32> -> vector<8x32xf32>
    %c16 = arith.constant 16 : index
    %c0_7 = arith.constant 0 : index
    %5 = vector.load %arg4[%c16, %c0_7] : memref<176x32xf32, #tpu.memory_space<vmem>>, vector<8x32xf32>
    %cst_8 = arith.constant dense<0.000000e+00> : vector<8x32xf32>
    %6 = tpu.matmul %1, %5, %cst_8 {dimension_numbers = #tpu.dot_dimension_numbers<[1], [0], [0], [1], [0, 0, 1, 1], [], []>} : vector<8x8xf32>, vector<8x32xf32>, vector<8x32xf32> -> vector<8x32xf32>
    %7 = arith.addf %4, %6 : vector<8x32xf32>
    %c24 = arith.constant 24 : index
    %c0_9 = arith.constant 0 : index
    %8 = vector.load %arg4[%c24, %c0_9] : memref<176x32xf32, #tpu.memory_space<vmem>>, vector<1x32xf32>
    %9 = vector.broadcast %8 : vector<1x32xf32> to vector<8x32xf32>
    %10 = arith.addf %7, %9 : vector<8x32xf32>
    %cst_10 = arith.constant 0.000000e+00 : f32
    %11 = vector.broadcast %cst_10 : f32 to vector<8x32xf32>
    %12 = arith.maximumf %10, %11 : vector<8x32xf32>
    %c32 = arith.constant 32 : index
    %c0_11 = arith.constant 0 : index
    %13 = vector.load %arg4[%c32, %c0_11] : memref<176x32xf32, #tpu.memory_space<vmem>>, vector<32x32xf32>
    %cst_12 = arith.constant dense<0.000000e+00> : vector<8x32xf32>
    %14 = tpu.matmul %12, %13, %cst_12 {dimension_numbers = #tpu.dot_dimension_numbers<[1], [0], [0], [1], [0, 0, 1, 1], [], []>} : vector<8x32xf32>, vector<32x32xf32>, vector<8x32xf32> -> vector<8x32xf32>
    %c64 = arith.constant 64 : index
    %c0_13 = arith.constant 0 : index
    %15 = vector.load %arg4[%c64, %c0_13] : memref<176x32xf32, #tpu.memory_space<vmem>>, vector<1x32xf32>
    %16 = vector.broadcast %15 : vector<1x32xf32> to vector<8x32xf32>
    %17 = arith.addf %14, %16 : vector<8x32xf32>
    %18 = vector.extract_strided_slice %17 {offsets = [0, 0], sizes = [8, 4], strides = [1, 1]} : vector<8x32xf32> to vector<8x4xf32>
    %19 = vector.extract_strided_slice %17 {offsets = [0, 4], sizes = [8, 4], strides = [1, 1]} : vector<8x32xf32> to vector<8x4xf32>
    %cst_14 = arith.constant 5.000000e-01 : f32
    %20 = vector.broadcast %cst_14 : f32 to vector<8x4xf32>
    %21 = arith.mulf %20, %19 : vector<8x4xf32>
    %22 = math.exp %21 : vector<8x4xf32>
    %23 = arith.mulf %2, %22 : vector<8x4xf32>
    %24 = arith.addf %18, %23 : vector<8x4xf32>
    %c72 = arith.constant 72 : index
    %c0_15 = arith.constant 0 : index
    %25 = vector.load %arg4[%c72, %c0_15] : memref<176x32xf32, #tpu.memory_space<vmem>>, vector<4x32xf32>
    %cst_16 = arith.constant dense<0.000000e+00> : vector<8x32xf32>
    %26 = tpu.matmul %24, %25, %cst_16 {dimension_numbers = #tpu.dot_dimension_numbers<[1], [0], [0], [1], [0, 0, 1, 1], [], []>} : vector<8x4xf32>, vector<4x32xf32>, vector<8x32xf32> -> vector<8x32xf32>
    %c80 = arith.constant 80 : index
    %c0_17 = arith.constant 0 : index
    %27 = vector.load %arg4[%c80, %c0_17] : memref<176x32xf32, #tpu.memory_space<vmem>>, vector<8x32xf32>
    %cst_18 = arith.constant dense<0.000000e+00> : vector<8x32xf32>
    %28 = tpu.matmul %1, %27, %cst_18 {dimension_numbers = #tpu.dot_dimension_numbers<[1], [0], [0], [1], [0, 0, 1, 1], [], []>} : vector<8x8xf32>, vector<8x32xf32>, vector<8x32xf32> -> vector<8x32xf32>
    %29 = arith.addf %26, %28 : vector<8x32xf32>
    %c88 = arith.constant 88 : index
    %c0_19 = arith.constant 0 : index
    %30 = vector.load %arg4[%c88, %c0_19] : memref<176x32xf32, #tpu.memory_space<vmem>>, vector<1x32xf32>
    %31 = vector.broadcast %30 : vector<1x32xf32> to vector<8x32xf32>
    %32 = arith.addf %29, %31 : vector<8x32xf32>
    %cst_20 = arith.constant 0.000000e+00 : f32
    %33 = vector.broadcast %cst_20 : f32 to vector<8x32xf32>
    %34 = arith.maximumf %32, %33 : vector<8x32xf32>
    %c96 = arith.constant 96 : index
    %c0_21 = arith.constant 0 : index
    %35 = vector.load %arg4[%c96, %c0_21] : memref<176x32xf32, #tpu.memory_space<vmem>>, vector<32x32xf32>
    %cst_22 = arith.constant dense<0.000000e+00> : vector<8x32xf32>
    %36 = tpu.matmul %34, %35, %cst_22 {dimension_numbers = #tpu.dot_dimension_numbers<[1], [0], [0], [1], [0, 0, 1, 1], [], []>} : vector<8x32xf32>, vector<32x32xf32>, vector<8x32xf32> -> vector<8x32xf32>
    %c128 = arith.constant 128 : index
    %c0_23 = arith.constant 0 : index
    %37 = vector.load %arg4[%c128, %c0_23] : memref<176x32xf32, #tpu.memory_space<vmem>>, vector<1x32xf32>
    %38 = vector.broadcast %37 : vector<1x32xf32> to vector<8x32xf32>
    %39 = arith.addf %36, %38 : vector<8x32xf32>
    %cst_24 = arith.constant 0.000000e+00 : f32
    %40 = vector.broadcast %cst_24 : f32 to vector<8x32xf32>
    %41 = arith.maximumf %39, %40 : vector<8x32xf32>
    %c136 = arith.constant 136 : index
    %c0_25 = arith.constant 0 : index
    %42 = vector.load %arg4[%c136, %c0_25] : memref<176x32xf32, #tpu.memory_space<vmem>>, vector<32x32xf32>
    %cst_26 = arith.constant dense<0.000000e+00> : vector<8x32xf32>
    %43 = tpu.matmul %41, %42, %cst_26 {dimension_numbers = #tpu.dot_dimension_numbers<[1], [0], [0], [1], [0, 0, 1, 1], [], []>} : vector<8x32xf32>, vector<32x32xf32>, vector<8x32xf32> -> vector<8x32xf32>
    %c168 = arith.constant 168 : index
    %c0_27 = arith.constant 0 : index
    %44 = vector.load %arg4[%c168, %c0_27] : memref<176x32xf32, #tpu.memory_space<vmem>>, vector<1x32xf32>
    %45 = vector.broadcast %44 : vector<1x32xf32> to vector<8x32xf32>
    %46 = arith.addf %43, %45 : vector<8x32xf32>
    %47 = vector.extract_strided_slice %46 {offsets = [0, 0], sizes = [8, 16], strides = [1, 1]} : vector<8x32xf32> to vector<8x16xf32>
    %48 = vector.extract_strided_slice %17 {offsets = [0, 0], sizes = [8, 8], strides = [1, 1]} : vector<8x32xf32> to vector<8x8xf32>
    %49 = tpu.concatenate %47, %48 in 1 : vector<8x16xf32>, vector<8x8xf32> -> vector<8x24xf32>
    %c0_28 = arith.constant 0 : index
    %c0_29 = arith.constant 0 : index
    %50 = vector.load %arg5[%c0_28, %c0_29] : memref<8x24xf32, #tpu.memory_space<vmem>>, vector<8x24xf32>
    tpu.vector_store %arg5[%c0_28, %c0_29], %49 {strides = array<i32>} : memref<8x24xf32, #tpu.memory_space<vmem>>, vector<8x24xf32>,
    return
  }
  func.func @transform_0(%arg0: i32) -> (i32, i32) {
    %c0_i32 = arith.constant 0 : i32
    %c0_i32_0 = arith.constant 0 : i32
    return %arg0, %c0_i32 : i32, i32
  }
  func.func @transform_1(%arg0: i32) -> (i32, i32) {
    %c0_i32 = arith.constant 0 : i32
    %c0_i32_0 = arith.constant 0 : i32
    return %arg0, %c0_i32 : i32, i32
  }
  func.func @transform_2(%arg0: i32) -> (i32, i32) {
    %c0_i32 = arith.constant 0 : i32
    %c0_i32_0 = arith.constant 0 : i32
    return %arg0, %c0_i32 : i32, i32
  }
  func.func @transform_3(%arg0: i32) -> (i32, i32) {
    %c0_i32 = arith.constant 0 : i32
    %c0_i32_0 = arith.constant 0 : i32
    %c0_i32_1 = arith.constant 0 : i32
    return %c0_i32, %c0_i32_0 : i32, i32
  }
  func.func @transform_4(%arg0: i32) -> (i32, i32) {
    %c0_i32 = arith.constant 0 : i32
    %c0_i32_0 = arith.constant 0 : i32
    return %arg0, %c0_i32 : i32, i32
  }
}

</mosaic_0001>

<bundles_post_ra>
// kernel: tpu_custom_call.1
= control target key start
LH: loop header
LB: loop body
LE: loop exit
PB: predicated region body
PF: predicated region fallthrough
CT: control target
= control target key end

     0   :  { %v759_v3 = vmov 0.0|0.0   ;;  %v760_v4 = vmov 0.0   ;;  %vm24_vm0 = vcmask 64512   ;;  %s908_s0 = inlined_call_operand.vmem [shape: f32[8,16], index: 0, kind: input, shape index: {}]   ;;  %s909_s1 = inlined_call_operand.vmem [shape: f32[8,8], index: 1, kind: input, shape index: {}]   ;;  %s910_s2 = inlined_call_operand.vmem [shape: f32[8,4], index: 2, kind: input, shape index: {}]   ;;  %s911_s3 = inlined_call_operand.vmem [shape: f32[176,32], index: 3, kind: input, shape index: {}]   ;;  %s912_s4 = inlined_call_operand.hbm [shape: f32[8,24], index: 4, kind: output, shape index: {}]  }
   0x1   :  { %v21_v0 = vld [vmem:[%s911_s3] sm:$0xff]  ;;  %v22_v1 = vld [vmem:[%s911_s3 + $0x8] sm:$0xff]  ;;  %v23_v2 = vld [vmem:[%s911_s3 + $0x10] sm:$0xff]  ;;  %706 = vmatprep.subr.bf16.mxu1 %v759_v3  ;;  %651 = vmatprep.subr.mxu0 %v760_v4 }
   0x2   :  { %v707_v5 = vpack.c.bf16 %v22_v1, %v21_v0  ;;  %v19_v6 = vld [vmem:[%s909_s1] sm:$0xff] }
   0x3   :  { %9 = vsyncpa [#allocation3], 0  ;;  %652 = vmatpush3.msra.mxu0 %v23_v2  ;;  %vm761_vm1 = vmmov 0   ;;  %v18_v7 = vld [vmem:[%s908_s0] sm:$0xff]  ;;  %vm98_vm2 = vcmask 130048   ;;  %v180_v9 = vld [vmem:[%s911_s3 + $0x28] sm:$0xff] }
   0x4   :  { %653 = vmatprep.mubr.msk.f32.mxu0 %vm761_vm1, %v760_v4  ;;  %708 = vmatpush3.bf16.msra.mxu1 %v707_v5  ;;  %v179_v8 = vld [vmem:[%s911_s3 + $0x20] sm:$0xff]  ;;  %v181_v11 = vld [vmem:[%s911_s3 + $0x30] sm:$0xff]  ;;  %v182_v12 = vld [vmem:[%s911_s3 + $0x38] sm:$0xff]  ;;  %vm188_vm3 = vcmask 261120   ;;  %vm347_vm4 = vcmask 1043456   ;;  %s762_s13 = smov 124  }
   0x5   :  { %654 = vmatmul.mubr.msk.f32.vlgmr.msra.gmra.mrb[0].mxu0 %vm24_vm0, %v19_v6  ;;  %660 = vmatprep.mubr.msk.f32.mxu1 %vm761_vm1, %v760_v4  ;;  %v710_v10 = vpack.c.bf16 %v180_v9, %v179_v8  ;;  %v713_v13 = vpack.c.bf16 %v182_v12, %v181_v11  ;;  %v616_v17 = vld [vmem:[%s911_s3 + $0x18] ss:$0 sm:$0xff]  ;;  %v272_v22 = vld [vmem:[%s911_s3 + $0x50] sm:$0xff]  ;;  %v617_v23 = vld [vmem:[%s911_s3 + $0x40] ss:$0 sm:$0xff]  ;;  %s763_s14 = smov 16  }
   0x6   :  { %709 = vmatprep.subr.bf16.mxu0 %v759_v3  ;;  %671 = vmatprep.mubr.msk.f32.mxu0 %vm761_vm1, %v760_v4  ;;  %v271_v29 = vld [vmem:[%s911_s3 + $0x48] sm:$0xf]  ;;  %v20_v33 = vld [vmem:[%s910_s2] sm:$0xff]  ;;  %vm343_vm5 = vcmask 31744   ;;  %v430_v40 = vld [vmem:[%s911_s3 + $0x70] sm:$0xff]  ;;  %s764_s10 = smov [#allocation2]  }
   0x7   :  { %674 = vmatprep.subr.mxu1 %v760_v4  ;;  %661 = vmatmul.mubr.msk.f32.vlgmr.msra.gmra.mrb[0].mxu1 %vm98_vm2, %v18_v7  ;;  %v428_v37 = vld [vmem:[%s911_s3 + $0x60] sm:$0xff]  ;;  %v429_v38 = vld [vmem:[%s911_s3 + $0x68] sm:$0xff]  ;;  %v431_v41 = vld [vmem:[%s911_s3 + $0x78] sm:$0xff]  ;;  %s606_s11 = sshll.u32 %s764_s10, 4  ;;  %vm598_vm6 = vcmask 195584   ;;  %s607_s11 = int_to_ptr.vmem [resolvable:$true] %s606_s11 }
   0x8   :  { %676 = vmatprep.mubr.msk.f32.mxu1 %vm761_vm1, %v760_v4  ;;  %711 = vmatpush3.bf16.msra.mxu0 %v710_v10  ;;  %v716_v39 = vpack.c.bf16 %v429_v38, %v428_v37  ;;  %v719_v42 = vpack.c.bf16 %v431_v41, %v430_v40  ;;  %v511_v43 = vld [vmem:[%s911_s3 + $0x88] sm:$0xff]  ;;  %v512_v44 = vld [vmem:[%s911_s3 + $0x90] sm:$0xff]  ;;  %v622_v47 = vld [vmem:[%s911_s3 + $0x58] ss:$0 sm:$0xff]  ;;  %s735_s12 = scalar_lea.vmem %s607_s11, 128  ;;  %p740_p1 = scmp.lt.s32.totalorder %s607_s11, %s607_s11 }
   0x9   :  { %712 = vmatprep.subr.bf16.mxu0 %v759_v3  ;;  %675 = vmatpush3.msra.mxu1 %v272_v22  ;;  %v722_v45 = vpack.c.bf16 %v512_v44, %v511_v43  ;;  %v513_v52 = vld [vmem:[%s911_s3 + $0x98] sm:$0xff]  ;;  %v514_v53 = vld [vmem:[%s911_s3 + $0xa0] sm:$0xff]  ;;  %v625_v60 = vld [vmem:[%s911_s3 + $0xa8] ss:$0 sm:$0xff]  ;;  %p736_p0 = scmp.ne.s32.totalorder %s607_s11, %s735_s12  ;;  %p741_p2 = scmp.lt.s32.totalorder %s735_s12, %s735_s12 }
   0xa   :  { %679 = vmatprep.subr.mxu1 %v760_v4  ;;  %v725_v54 = vpack.c.bf16 %v514_v53, %v513_v52  ;;  %v623_v55 = vld [vmem:[%s911_s3 + $0x80] ss:$0 sm:$0xff] }
   0xb   :  { %677 = vmatmul.mubr.msk.f32.vlgmr.msra.gmra.mrb[2].mxu1 %vm24_vm0, %v19_v6  ;;  %p742_p3 = por %p741_p2, %p740_p1 }
   0xc   :  { %714 = vmatpush3.bf16.msra.mxu0 %v713_v13  ;;  %681 = vmatprep.mubr.msk.f32.mxu1 %vm761_vm1, %v760_v4 }
   0xd   :  { %715 = vmatprep.subr.bf16.mxu0 %v759_v3  ;;  %680 = vmatpush3.msk.msra.mxu1 %vm347_vm4, %v271_v29  ;;  %p743_p4 = pnand %p742_p3, %p736_p0 }
   0xe   :  { %721 = vmatprep.subr.bf16.mxu1 %v759_v3 }
  0xd8   :  { %v94_v14 = vpop.f32.mrb[0].mxu0 }
  0xd9   :  { %v655_v15 = vpop.f32.mrb[1].mxu0 }
  0xda   :  { %v168_v16 = vpop.f32.mrb[0].mxu1 }
  0xdb   :  { %v169_v18 = vadd.f32 %v168_v16, %v94_v14  ;;  %v662_v19 = vpop.f32.mrb[1].mxu1 }
  0xdd   :  { %v177_v20 = vadd.f32 %v616_v17, %v169_v18 }
  0xde   :  { %v339_v31 = vpop.f32.mrb[2].mxu1 }
  0xdf   :  { %v178_v21 = vmax.f32 %v177_v20, 0.0  ;;  %v678_v32 = vpop.f32.mrb[3].mxu1 }
  0xe1   :  { %672 = vmatmul.mubr.msk.f32.vlgmr.msra.gmra.mrb[2].mxu0 %vm188_vm3, %v178_v21 }
  0xe2   :  { %692 = vmatprep.mubr.msk.f32.mxu0 %vm761_vm1, %v760_v4  ;;  %717 = vmatpush3.bf16.msra.mxu0 %v716_v39 }
  0xe3   :  { %718 = vmatprep.subr.bf16.mxu0 %v759_v3 }
  0xe6   :  { %720 = vmatpush3.bf16.msra.mxu0 %v719_v42 }
 0x1b4   :  { %v258_v24 = vpop.f32.mrb[2].mxu0 }
 0x1b5   :  { %v259_v25 = vadd.f32 %v617_v23, %v258_v24  ;;  %v673_v26 = vpop.f32.mrb[3].mxu0 }
 0x1b7   :  { %v262_v27 = vmul.f32 0.5, %v259_v25 }
 0x1b9   :  { %v263_v28 = vmul.f32 1.442695, %v262_v27 }
 0x1bb   :  { %733 = vpow2.f32 %v263_v28 }
 0x1c5   :  { %v734_v30 = vpop.eup %733 }
 0x1c6   :  { %266 = vrot.lane.b32.xlu0 %v734_v30, %s762_s13 }
 0x1ca   :  { %594 = vrot.lane.b32.xlu0 %v259_v25, %s763_s14 }
 0x238   :  { %v267_v34 = vpop.permute.xlu0 %266 }
 0x239   :  { %v269_v35 = vmul.f32 %v267_v34, %v20_v33 }
 0x23b   :  { %v270_v36 = vadd.f32 %v269_v35, %v259_v25 }
 0x23c   :  { %v595_v0 = vpop.permute.xlu0 %594 }
 0x23d   :  { %682 = vmatmul.mubr.msk.f32.vlgmr.msra.gmra.mrb[4].mxu1 %vm343_vm5, %v270_v36 }
 0x23e   :  { %703 = vmatprep.mubr.msk.f32.mxu1 %vm761_vm1, %v760_v4  ;;  %723 = vmatpush3.bf16.msra.mxu1 %v722_v45 }
 0x23f   :  { %724 = vmatprep.subr.bf16.mxu1 %v759_v3 }
 0x242   :  { %726 = vmatpush3.bf16.msra.mxu1 %v725_v54 }
 0x310   :  { %v417_v46 = vpop.f32.mrb[4].mxu1 }
 0x311   :  { %v418_v48 = vadd.f32 %v417_v46, %v339_v31  ;;  %v683_v49 = vpop.f32.mrb[5].mxu1 }
 0x313   :  { %v426_v50 = vadd.f32 %v622_v47, %v418_v48 }
 0x315   :  { %v427_v51 = vmax.f32 %v426_v50, 0.0 }
 0x317   :  { %693 = vmatmul.mubr.msk.f32.vlgmr.msra.gmra.mrb[4].mxu0 %vm188_vm3, %v427_v51 }
 0x3ea   :  { %v506_v56 = vpop.f32.mrb[4].mxu0 }
 0x3eb   :  { %v507_v57 = vadd.f32 %v623_v55, %v506_v56  ;;  %v694_v58 = vpop.f32.mrb[5].mxu0 }
 0x3ed   :  { %v510_v59 = vmax.f32 %v507_v57, 0.0 }
 0x3ef   :  { %704 = vmatmul.mubr.msk.f32.vlgmr.msra.gmra.mrb[6].mxu1 %vm188_vm3, %v510_v59 }
 0x4c2   :  { %v589_v61 = vpop.f32.mrb[6].mxu1 }
 0x4c3   :  { %v590_v62 = vadd.f32 %v625_v60, %v589_v61  ;;  %v705_v63 = vpop.f32.mrb[7].mxu1 }
 0x4c5   :  { %v597_v1 = vsel %vm98_vm2, %v590_v62, %v595_v0 }
 0x4c6   :  { %599 = vst.msk [vmem:[#allocation2] sm:$0xff] %vm598_vm6, %v597_v1 }
 0x4c7   :  { %746 = shalt.err (!%p743_p4)
}
 0x4c8   :  { %s747_s14 = scalar_lea.hbm %s912_s4, 128 }
 0x4c9   :  { %p748_p5 = scmp.ne.s32.totalorder %s912_s4, %s747_s14  ;;  %p751_p6 = scmp.lt.u32.totalorder %s747_s14, %s912_s4 }
 0x4cb   :  { %p753_p7 = pnand %p751_p6, %p748_p5 }
 0x4cd   :  { %756 = shalt.err (!%p753_p7)
}
 0x4ce   :  { %609 = dma.vmem_to_hbm [thread:$0]  %s607_s11, 128, %s912_s4, [#allocation3]  }
 0x4cf   :  { %757 = dma.done.wait [#allocation3], 128  }
 0x4d0   :  { %758 = vsyncadd [#allocation3], 4294967168 }
 0x4d1   :  { %613 = vsyncpa [#allocation3], 1 }

</bundles_post_ra>
